<compile_context>
chip_gen: v5e
topology: v5e:2x2
jax: 0.10.0
libtpu: 0.0.40
codegen_flags: <defaults>
</compile_context>

<pallas_src>
import jax
import jax.numpy as jnp
from jax.experimental import pallas as pl
from jax.experimental.pallas import tpu as pltpu

_BLOCK_BYTES = 4 * 1024 * 1024  # ~4 MiB per block (review: best for v6e/v7x)


def _param_sigmoid_kernel(p_ref, x_ref, o_ref):
    # p_ref: SMEM (1,) f32 scalar; x_ref / o_ref: VMEM tiles.
    p = p_ref[0]
    x = x_ref[...].astype(jnp.float32)
    # 1 / (1 + exp(p * x)); exp goes to the EUP, compute in f32, cast on store.
    y = 1.0 / (1.0 + jnp.exp(p * x))
    o_ref[...] = y.astype(o_ref.dtype)


def _choose_lane_width(n, sublane_mult):
    """Largest lane width dividing n, preferring widths that give >= one full
    sublane group of rows.  Returns None if n is not a multiple of 128."""
    for lane in (1024, 512, 256, 128):
        if n % lane == 0 and (n // lane) >= sublane_mult:
            return lane
    for lane in (1024, 512, 256, 128):
        if n % lane == 0:
            return lane
    return None


def parametric_sigmoid(x, learnable_param=-10.0):
    """Elementwise 1/(1+exp(p*x)) via a Pallas TPU kernel.

    x: any-shaped float array (e.g. NCHW).  Returns same shape/dtype.
    """
    orig_shape = x.shape
    dtype = x.dtype
    n = x.size
    itemsize = jnp.dtype(dtype).itemsize
    # Dtype-aware sublane multiple: 8 (f32), 16 (bf16), 32 (int8/fp8).
    sm = max(8, 32 // itemsize)

    p = jnp.asarray([learnable_param], dtype=jnp.float32)

    lane = _choose_lane_width(n, sm)
    padded = False
    if lane is None:
        # Ragged tail (< 128 elements worth of misalignment).
        # TODO(synk): handle the ragged tail with a tiny separate kernel instead
        # of this pad + slice (each a full-array HBM pass); the fast path above
        # covers all 128-aligned sizes with zero extra traffic.
        lane = 128
        n_pad = pl.cdiv(n, lane) * lane
        xf = jnp.pad(x.reshape(-1), (0, n_pad - n))
        padded = True
    else:
        n_pad = n
        xf = x.reshape(-1)  # free bitcast: contiguous row-major flatten

    rows = n_pad // lane

    # Row tile targeting ~_BLOCK_BYTES per block, rounded to the sublane multiple.
    tr_budget = max(sm, (_BLOCK_BYTES // (lane * itemsize)) // sm * sm)
    if rows < sm:
        tr = rows  # full (tiny) extent is always a legal block dim
    else:
        tr = min(tr_budget, (rows // sm) * sm)
        # v7x has 2 TensorCores; keep the parallel grid >= 2 steps when the
        # input is big enough to split.
        if pl.cdiv(rows, tr) < 2 and rows >= 2 * sm:
            half = (((rows + 1) // 2) + sm - 1) // sm * sm
            tr = min(tr, half)

    grid = (pl.cdiv(rows, tr),)  # last block may be partial; Pallas masks it
    x2 = xf.reshape(rows, lane)

    out2 = pl.pallas_call(
        _param_sigmoid_kernel,
        out_shape=jax.ShapeDtypeStruct((rows, lane), dtype),
        grid=grid,
        in_specs=[
            pl.BlockSpec(memory_space=pltpu.MemorySpace.SMEM),  # scalar param
            pl.BlockSpec((tr, lane), lambda i: (i, 0)),         # x tile (lane-dense)
        ],
        out_specs=pl.BlockSpec((tr, lane), lambda i: (i, 0)),
        compiler_params=pltpu.CompilerParams(
            dimension_semantics=("parallel",),
            # 4 MiB blocks * 4 buffers = 16 MiB sits exactly at v5e's scoped
            # default; raise the limit (safe on all gens, <= v7x physical 64 MiB).
            vmem_limit_bytes=32 * 1024 * 1024,
        ),
    )(p, x2)

    out = out2.reshape(-1)
    if padded:
        out = out[:n]
    return out.reshape(orig_shape)


if __name__ == "__main__":
    key = jax.random.PRNGKey(0)
    # NCHW input, like the PyTorch module would receive.
    x = jax.random.normal(key, (2, 4, 16, 16), dtype=jnp.float32)

    learnable_param = -10.0
    out = parametric_sigmoid(x, learnable_param)
    out = jax.block_until_ready(out)

    # Reference check in plain JAX.
    ref = 1.0 / (1.0 + jnp.exp(learnable_param * x))
    assert out.shape == x.shape
    assert out.dtype == x.dtype
    assert jnp.allclose(out, ref, atol=1e-6, rtol=1e-6)

    print("KERNEL_OK")
</pallas_src>

<mosaic_0001>
module attributes {stable_mosaic.version = 11 : i64} {
  func.func @_param_sigmoid_kernel(%arg0: i32, %arg1: memref<1xf32, #tpu.memory_space<smem>>, %arg2: memref<8x256xf32, #tpu.memory_space<vmem>>, %arg3: memref<8x256xf32, #tpu.memory_space<vmem>>) attributes {dimension_semantics = [#tpu.dimension_semantics<parallel>], iteration_bounds = array<i64: 1>, scalar_prefetch = 0 : i64, scratch_operands = 0 : i64, tpu.core_type = #tpu.core_type<tc>, window_params = [{transform_indices = @transform_0, window_bounds = array<i64: 1>}, {transform_indices = @transform_1, window_bounds = array<i64: 8, 256>}, {transform_indices = @transform_2, window_bounds = array<i64: 8, 256>}]} {
    %c0 = arith.constant 0 : index
    %0 = memref.load %arg1[%c0] : memref<1xf32, #tpu.memory_space<smem>>
    %c0_0 = arith.constant 0 : index
    %c0_1 = arith.constant 0 : index
    %1 = vector.load %arg2[%c0_0, %c0_1] : memref<8x256xf32, #tpu.memory_space<vmem>>, vector<8x256xf32>
    %2 = vector.broadcast %0 : f32 to vector<8x256xf32>
    %3 = arith.mulf %2, %1 : vector<8x256xf32>
    %4 = math.exp %3 : vector<8x256xf32>
    %cst = arith.constant 1.000000e+00 : f32
    %5 = vector.broadcast %cst : f32 to vector<8x256xf32>
    %6 = arith.addf %5, %4 : vector<8x256xf32>
    %cst_2 = arith.constant 1.000000e+00 : f32
    %7 = vector.broadcast %cst_2 : f32 to vector<8x256xf32>
    %8 = arith.divf %7, %6 : vector<8x256xf32>
    %c0_3 = arith.constant 0 : index
    %c0_4 = arith.constant 0 : index
    %9 = vector.load %arg3[%c0_3, %c0_4] : memref<8x256xf32, #tpu.memory_space<vmem>>, vector<8x256xf32>
    tpu.vector_store %arg3[%c0_3, %c0_4], %8 {strides = array<i32>} : memref<8x256xf32, #tpu.memory_space<vmem>>, vector<8x256xf32>,
    return
  }
  func.func @transform_0(%arg0: i32) -> i32 {
    %c0_i32 = arith.constant 0 : i32
    %c0_i32_0 = arith.constant 0 : i32
    return %c0_i32 : i32
  }
  func.func @transform_1(%arg0: i32) -> (i32, i32) {
    %c0_i32 = arith.constant 0 : i32
    %c0_i32_0 = arith.constant 0 : i32
    return %arg0, %c0_i32 : i32, i32
  }
  func.func @transform_2(%arg0: i32) -> (i32, i32) {
    %c0_i32 = arith.constant 0 : i32
    %c0_i32_0 = arith.constant 0 : i32
    return %arg0, %c0_i32 : i32, i32
  }
}

</mosaic_0001>

<bundles_post_ra>
// kernel: tpu_custom_call.1
= control target key start
LH: loop header
LB: loop body
LE: loop exit
PB: predicated region body
PF: predicated region fallthrough
CT: control target
= control target key end

     0   :  { %8 = vsyncpa [#allocation4], 0  ;;  %s176_s0 = inlined_call_operand.<no memory space> [shape: f32[1], index: 0, kind: input, shape index: {}]   ;;  %s177_s1 = inlined_call_operand.hbm [shape: f32[8,256], index: 1, kind: input, shape index: {}]   ;;  %s178_s2 = inlined_call_operand.hbm [shape: f32[8,256], index: 2, kind: output, shape index: {}]  }
   0x1   :  { %9 = vsyncpa [#allocation5], 0  ;;  %s17_s11 = sshll.u32 %s177_s1, 4  ;;  %s150_s12 = smov [#allocation3]   ;;  %s18_s11 = int_to_ptr.hbm [resolvable:$true] %s17_s11 }
   0x2   :  { %s19_s13 = sshll.u32 %s150_s12, 4  ;;  %s20_s13 = int_to_ptr.vmem [resolvable:$true] %s19_s13 }
   0x3   :  { %22 = dma.hbm_to_vmem [thread:$0]  %s18_s11, 256, %s20_s13, [#allocation4]  }
   0x4   :  { %146 = dma.done.wait [#allocation4], 256  }
   0x5   :  { %147 = vsyncadd [#allocation4], 4294967040  ;;  %v30_v0 = vstv %s176_s0  ;;  %v28_v1 = vld [vmem:[#allocation3] sm:$0xff]  ;;  %v29_v2 = vld [vmem:[#allocation3 + $0x8] sm:$0xff]  ;;  %s151_s0 = smov [#allocation6]   ;;  %s78_s18 = sshll.u32 %s178_s2, 4  ;;  %s79_s18 = int_to_ptr.hbm [resolvable:$true] %s78_s18 }
   0x6   :  { %v31_v3 = vmul.f32 %v30_v0, %v28_v1  ;;  %v32_v4 = vmul.f32 %v30_v0, %v29_v2  ;;  %s76_s1 = sshll.u32 %s151_s0, 4  ;;  %s77_s1 = int_to_ptr.vmem [resolvable:$true] %s76_s1 }
   0x8   :  { %v33_v5 = vmul.f32 1.442695, %v31_v3  ;;  %v35_v6 = vmul.f32 1.442695, %v32_v4 }
   0xa   :  { %90 = vpow2.f32 %v33_v5 }
   0xb   :  { %92 = vpow2.f32 %v35_v6 }
  0x10   :  { %v91_v7 = vpop.eup %90 }
  0x11   :  { %v93_v8 = vpop.eup %92  ;;  %v37_v9 = vadd.f32 1.0, %v91_v7 }
  0x12   :  { %v38_v10 = vadd.f32 1.0, %v93_v8 }
  0x13   :  { %94 = vrcp.f32 %v37_v9  ;;  %vm44_vm0 = vweird.f32 %v37_v9  ;;  %v50_v14 = vand.u32 2147483648, %v37_v9  ;;  %v48_v17 = vand.u32 2147483647, %v37_v9 }
  0x14   :  { %96 = vrcp.f32 %v38_v10  ;;  %v65_v18 = vand.u32 2147483648, %v38_v10  ;;  %vm59_vm2 = vweird.f32 %v38_v10  ;;  %v63_v20 = vand.u32 2147483647, %v38_v10 }
  0x15   :  { %v51_v22 = vor.u32 1.1754944e-38, %v50_v14  ;;  %vm49_vm5 = vcmp.eq.f32.partialorder %v48_v17, 8.507059e+37 }
  0x16   :  { %v66_v25 = vor.u32 1.1754944e-38, %v65_v18  ;;  %vm64_vm7 = vcmp.eq.f32.partialorder %v63_v20, 8.507059e+37 }
  0x19   :  { %v95_v11 = vpop.eup %94 }
  0x1a   :  { %v97_v12 = vpop.eup %96  ;;  %v40_v13 = vmul.f32 %v95_v11, %v37_v9  ;;  %vm45_vm1 = vweird.f32 %v95_v11 }
  0x1b   :  { %v55_v15 = vmul.f32 %v97_v12, %v38_v10  ;;  %vm60_vm3 = vweird.f32 %v97_v12  ;;  %vm46_vm4 = vmor %vm44_vm0, %vm45_vm1 }
  0x1c   :  { %v41_v16 = vsub.f32 1.0, %v40_v13  ;;  %vm61_vm6 = vmor %vm59_vm2, %vm60_vm3 }
  0x1d   :  { %v56_v19 = vsub.f32 1.0, %v55_v15 }
  0x1e   :  { %v42_v21 = vmul.f32 %v95_v11, %v41_v16 }
  0x1f   :  { %v57_v23 = vmul.f32 %v97_v12, %v56_v19 }
  0x20   :  { %v43_v24 = vadd.f32 %v95_v11, %v42_v21 }
  0x21   :  { %v58_v26 = vadd.f32 %v97_v12, %v57_v23 }
  0x22   :  { %v47_v27 = vsel %vm46_vm4, %v95_v11, %v43_v24 }
  0x23   :  { %v52_v28 = vsel %vm49_vm5, %v51_v22, %v47_v27  ;;  %v62_v29 = vsel %vm61_vm6, %v97_v12, %v58_v26 }
  0x24   :  { %69 = vst [vmem:[#allocation6] sm:$0xff] %v52_v28  ;;  %v67_v30 = vsel %vm64_vm7, %v66_v25, %v62_v29 }
  0x25   :  { %70 = vst [vmem:[#allocation6 + $0x8] sm:$0xff] %v67_v30 }
  0x26   :  { %81 = dma.vmem_to_hbm [thread:$0]  %s77_s1, 256, %s79_s18, [#allocation5]  }
  0x27   :  { %148 = dma.done.wait [#allocation5], 256  }
  0x28   :  { %149 = vsyncadd [#allocation5], 4294967040 }
  0x29   :  { %86 = vsyncpa [#allocation4], 1 }
  0x2a   :  { %87 = vsyncpa [#allocation5], 1 }

</bundles_post_ra>
